<compile_context>
chip_gen: v6e
topology: v6e:2x2x1
jax: 0.10.0
libtpu: 0.0.40
codegen_flags: <defaults>
</compile_context>

<pallas_src>
import functools

import jax
import jax.numpy as jnp
from jax.experimental import pallas as pl
from jax.experimental.pallas import tpu as pltpu

MATMUL_DTYPE = jnp.bfloat16   # MXU input dtype; accumulation is always f32
OUT_DTYPE = jnp.bfloat16      # kernel store dtype (wrapper casts back to f32)
LANE = 128                    # pad feature dims (last axis) to multiples of this
MIN_M_PAD = 128               # pad batch to at least the MXU height
TILE_M = 256                  # per-grid-step M tile (v6e/v7x MXU is 256-wide)
VMEM_RESIDENT_BUDGET = 48 << 20   # stay well under v7x's 64 MiB physical VMEM


def _round_up(n, m):
    return (n + m - 1) // m * m


def _fused_mlp_kernel(*refs, num_layers):
    """Whole MLP for one M tile; all weights/biases resident in VMEM.

    refs = (x_ref, w0_ref, b0_ref, w1_ref, b1_ref, ..., o_ref)
    For each layer: h = h @ W + b, ReLU on all but the last layer.
    MXU matmul in bf16 with f32 accumulation; bias/ReLU epilogue in f32 (VPU),
    activations carried between layers in bf16.
    """
    x_ref = refs[0]
    o_ref = refs[-1]
    wb = refs[1:-1]

    h = x_ref[...]                                       # (tile_m, K0_pad) bf16
    for i in range(num_layers):
        w_ref = wb[2 * i]
        b_ref = wb[2 * i + 1]
        y = jnp.dot(h, w_ref[...],
                    preferred_element_type=jnp.float32)  # MXU, f32 accumulate
        y = y + b_ref[...].astype(jnp.float32)           # bias in f32 (VPU)
        if i < num_layers - 1:
            y = jnp.maximum(y, 0.0)                      # ReLU (hidden layers)
            h = y.astype(MATMUL_DTYPE)                   # carry in bf16
        else:
            h = y
    o_ref[...] = h.astype(o_ref.dtype)                   # lane-dense bf16 store


def _vmem_budget_bytes(padded_params, tile_m, k0_pad, n_out_pad):
    """Static (trace-time) estimate of the VMEM working set."""
    weight_bytes = 0
    for w, b in padded_params:
        weight_bytes += w.size * jnp.dtype(w.dtype).itemsize
        weight_bytes += b.size * jnp.dtype(b.dtype).itemsize
    max_width = max([k0_pad, n_out_pad] + [w.shape[1] for w, _ in padded_params])
    io_bytes = 2 * (tile_m * k0_pad + tile_m * n_out_pad) * 2   # 2x buffered bf16 tiles
    act_bytes = tile_m * max_width * (4 + 2)                    # y f32 + h bf16
    return int(weight_bytes + io_bytes + act_bytes)


def fused_mlp_pallas(x2d, padded_params, *, tile_m):
    """x2d: (M_pad, K0_pad) in MATMUL_DTYPE; padded_params: [(W_pad, b_pad), ...].

    If M_pad == tile_m: single gridless call, everything resident in VMEM.
    Otherwise: 1-D "parallel" grid over M tiles; W/b index_maps return (0, 0)
    so the weights stay VMEM-resident across all grid steps.
    """
    num_layers = len(padded_params)
    m_pad, k0_pad = x2d.shape
    n_out_pad = padded_params[-1][0].shape[1]
    assert m_pad % tile_m == 0
    grid_m = m_pad // tile_m

    needed = _vmem_budget_bytes(padded_params, tile_m, k0_pad, n_out_pad)
    if needed > VMEM_RESIDENT_BUDGET:
        # TODO(synk): add a pipelined fallback that tiles the largest W over a
        # K/N grid ("arbitrary" reduction axis + f32 acc scratch) instead of
        # keeping every layer's weights VMEM-resident.
        raise NotImplementedError(
            f"MLP working set ({needed} bytes) exceeds the VMEM-resident "
            f"budget ({VMEM_RESIDENT_BUDGET} bytes) assumed by this kernel.")
    vmem_limit = int(min(max(4 * needed, 16 << 20), 60 << 20))

    flat_inputs = [x2d]
    for w, b in padded_params:
        flat_inputs += [w, b]

    kernel = functools.partial(_fused_mlp_kernel, num_layers=num_layers)
    out_shape = jax.ShapeDtypeStruct((m_pad, n_out_pad), OUT_DTYPE)

    if grid_m == 1:
        # Tiny/one-tile case: gridless, fully fused, fully VMEM-resident.
        return pl.pallas_call(
            kernel,
            out_shape=out_shape,
            in_specs=[pl.BlockSpec(memory_space=pltpu.MemorySpace.VMEM)
                      for _ in flat_inputs],
            out_specs=pl.BlockSpec(memory_space=pltpu.MemorySpace.VMEM),
            compiler_params=pltpu.CompilerParams(vmem_limit_bytes=vmem_limit),
        )(*flat_inputs)

    # M-tiled path: shard batch tiles across TensorCores; weights stay resident.
    in_specs = [pl.BlockSpec((tile_m, k0_pad), lambda i: (i, 0))]
    for w, b in padded_params:
        in_specs.append(pl.BlockSpec(w.shape, lambda i: (0, 0)))
        in_specs.append(pl.BlockSpec(b.shape, lambda i: (0, 0)))

    return pl.pallas_call(
        kernel,
        out_shape=out_shape,
        grid=(grid_m,),
        in_specs=in_specs,
        out_specs=pl.BlockSpec((tile_m, n_out_pad), lambda i: (i, 0)),
        compiler_params=pltpu.CompilerParams(
            dimension_semantics=("parallel",),
            vmem_limit_bytes=vmem_limit),
    )(*flat_inputs)


def init_mlp_params(key, input_size, hidden_sizes, num_classes):
    """Deterministic init mirroring nn.Linear default U(-1/sqrt(fan_in), +)."""
    sizes = [input_size] + list(hidden_sizes) + [num_classes]
    params = []
    for i in range(len(sizes) - 1):
        fan_in, fan_out = sizes[i], sizes[i + 1]
        key, kw, kb = jax.random.split(key, 3)
        bound = 1.0 / jnp.sqrt(fan_in)
        w = jax.random.uniform(kw, (fan_in, fan_out), jnp.float32, -bound, bound)
        b = jax.random.uniform(kb, (fan_out,), jnp.float32, -bound, bound)
        params.append((w, b))
    return params


def pad_params_for_kernel(params):
    """Zero-pad every layer's (in, out) to multiples of 128 lanes; cast W to bf16.

    Zero padding is exact: padded input features are zero, padded hidden units
    get w=0, b=0 -> ReLU(0)=0, padded output classes get w=0, b=0 -> 0 and are
    sliced away in the wrapper.
    """
    # TODO(synk): optional fp8 (v7x) / int8 per-channel (v6e/v5e) weight storage
    # with in-epilogue dequant would halve weight HBM bytes in the mem-bound regime.
    padded = []
    for w, b in params:
        k, n = w.shape
        k_pad, n_pad = _round_up(k, LANE), _round_up(n, LANE)
        w_p = jnp.zeros((k_pad, n_pad), MATMUL_DTYPE).at[:k, :n].set(
            w.astype(MATMUL_DTYPE))
        b_p = jnp.zeros((1, n_pad), jnp.float32).at[:, :n].set(
            b.astype(jnp.float32))
        padded.append((w_p, b_p))
    return padded


@functools.partial(jax.jit, static_argnames=("num_classes",))
def mlp_forward(x, padded_params, num_classes):
    """forward: x.view(x.size(0), -1) -> [Linear -> ReLU]* -> Linear."""
    batch = x.shape[0]
    h = x.reshape(batch, -1)                 # flatten, like x.view(B, -1)
    k0 = h.shape[1]
    k0_pad = padded_params[0][0].shape[0]

    # Pad M to at least the MXU height; tile across a parallel grid once the
    # batch exceeds one TILE_M tile.
    m_pad = max(_round_up(batch, MIN_M_PAD), MIN_M_PAD)
    if m_pad <= TILE_M:
        tile_m = m_pad                       # one tile -> gridless call
    else:
        m_pad = _round_up(batch, TILE_M)
        tile_m = TILE_M

    h = jnp.zeros((m_pad, k0_pad), MATMUL_DTYPE).at[:batch, :k0].set(
        h.astype(MATMUL_DTYPE))
    out = fused_mlp_pallas(h, padded_params, tile_m=tile_m)
    return out[:batch, :num_classes].astype(jnp.float32)


def mlp_reference(x, params):
    """Pure-JAX f32 reference for a sanity check."""
    h = x.reshape(x.shape[0], -1)
    for i, (w, b) in enumerate(params):
        h = h @ w + b
        if i < len(params) - 1:
            h = jnp.maximum(h, 0.0)
    return h


if __name__ == "__main__":
    key = jax.random.PRNGKey(0)
    key, kx = jax.random.split(key)

    # Small NCHW input: batch=8, C=4, H=8, W=8 -> input_size = 4*8*8 = 256
    batch, C, H, W = 8, 4, 8, 8
    input_size = C * H * W
    hidden_sizes = [256, 128]
    num_classes = 10

    x = jax.random.normal(kx, (batch, C, H, W), jnp.float32)
    params = init_mlp_params(key, input_size, hidden_sizes, num_classes)
    padded_params = pad_params_for_kernel(params)

    # Small batch: gridless, fully VMEM-resident path.
    out = mlp_forward(x, padded_params, num_classes)
    jax.block_until_ready(out)
    assert out.shape == (batch, num_classes)
    ref = mlp_reference(x, params)
    # Loose tolerance: bf16 MXU inputs / f32 accumulate, bf16 output store.
    assert jnp.allclose(out, ref, atol=5e-2, rtol=5e-2), "mismatch vs reference"

    # Larger batch: exercises the M-tiled "parallel" grid path (2 tiles of 256).
    key, kx2 = jax.random.split(key)
    big_batch = 300
    x_big = jax.random.normal(kx2, (big_batch, C, H, W), jnp.float32)
    out_big = mlp_forward(x_big, padded_params, num_classes)
    jax.block_until_ready(out_big)
    assert out_big.shape == (big_batch, num_classes)
    ref_big = mlp_reference(x_big, params)
    assert jnp.allclose(out_big, ref_big, atol=5e-2, rtol=5e-2), \
        "mismatch vs reference (tiled path)"

    print("KERNEL_OK")
</pallas_src>

<mosaic_0001>
module attributes {stable_mosaic.version = 11 : i64} {
  func.func @_fused_mlp_kernel(%arg0: memref<128x256xbf16, #tpu.memory_space<vmem>>, %arg1: memref<256x256xbf16, #tpu.memory_space<vmem>>, %arg2: memref<1x256xf32, #tpu.memory_space<vmem>>, %arg3: memref<256x128xbf16, #tpu.memory_space<vmem>>, %arg4: memref<1x128xf32, #tpu.memory_space<vmem>>, %arg5: memref<128x128xbf16, #tpu.memory_space<vmem>>, %arg6: memref<1x128xf32, #tpu.memory_space<vmem>>, %arg7: memref<128x128xbf16, #tpu.memory_space<vmem>>) attributes {dimension_semantics = [], scalar_prefetch = 0 : i64, scratch_operands = 0 : i64, tpu.core_type = #tpu.core_type<tc>} {
    %c0 = arith.constant 0 : index
    %c0_0 = arith.constant 0 : index
    %0 = vector.load %arg0[%c0, %c0_0] : memref<128x256xbf16, #tpu.memory_space<vmem>>, vector<128x256xbf16>
    %c0_1 = arith.constant 0 : index
    %c0_2 = arith.constant 0 : index
    %1 = vector.load %arg1[%c0_1, %c0_2] : memref<256x256xbf16, #tpu.memory_space<vmem>>, vector<256x256xbf16>
    %cst = arith.constant dense<0.000000e+00> : vector<128x256xf32>
    %2 = tpu.matmul %0, %1, %cst {dimension_numbers = #tpu.dot_dimension_numbers<[1], [0], [0], [1], [0, 0, 1, 1], [], []>} : vector<128x256xbf16>, vector<256x256xbf16>, vector<128x256xf32> -> vector<128x256xf32>
    %c0_3 = arith.constant 0 : index
    %c0_4 = arith.constant 0 : index
    %3 = vector.load %arg2[%c0_3, %c0_4] : memref<1x256xf32, #tpu.memory_space<vmem>>, vector<1x256xf32>
    %4 = vector.broadcast %3 : vector<1x256xf32> to vector<128x256xf32>
    %5 = arith.addf %2, %4 : vector<128x256xf32>
    %cst_5 = arith.constant 0.000000e+00 : f32
    %6 = vector.broadcast %cst_5 : f32 to vector<128x256xf32>
    %7 = arith.maximumf %5, %6 : vector<128x256xf32>
    %8 = arith.truncf %7 : vector<128x256xf32> to vector<128x256xbf16>
    %c0_6 = arith.constant 0 : index
    %c0_7 = arith.constant 0 : index
    %9 = vector.load %arg3[%c0_6, %c0_7] : memref<256x128xbf16, #tpu.memory_space<vmem>>, vector<256x128xbf16>
    %cst_8 = arith.constant dense<0.000000e+00> : vector<128x128xf32>
    %10 = tpu.matmul %8, %9, %cst_8 {dimension_numbers = #tpu.dot_dimension_numbers<[1], [0], [0], [1], [0, 0, 1, 1], [], []>} : vector<128x256xbf16>, vector<256x128xbf16>, vector<128x128xf32> -> vector<128x128xf32>
    %c0_9 = arith.constant 0 : index
    %c0_10 = arith.constant 0 : index
    %11 = vector.load %arg4[%c0_9, %c0_10] : memref<1x128xf32, #tpu.memory_space<vmem>>, vector<1x128xf32>
    %12 = vector.broadcast %11 : vector<1x128xf32> to vector<128x128xf32>
    %13 = arith.addf %10, %12 : vector<128x128xf32>
    %cst_11 = arith.constant 0.000000e+00 : f32
    %14 = vector.broadcast %cst_11 : f32 to vector<128x128xf32>
    %15 = arith.maximumf %13, %14 : vector<128x128xf32>
    %16 = arith.truncf %15 : vector<128x128xf32> to vector<128x128xbf16>
    %c0_12 = arith.constant 0 : index
    %c0_13 = arith.constant 0 : index
    %17 = vector.load %arg5[%c0_12, %c0_13] : memref<128x128xbf16, #tpu.memory_space<vmem>>, vector<128x128xbf16>
    %cst_14 = arith.constant dense<0.000000e+00> : vector<128x128xf32>
    %18 = tpu.matmul %16, %17, %cst_14 {dimension_numbers = #tpu.dot_dimension_numbers<[1], [0], [0], [1], [0, 0, 1, 1], [], []>} : vector<128x128xbf16>, vector<128x128xbf16>, vector<128x128xf32> -> vector<128x128xf32>
    %c0_15 = arith.constant 0 : index
    %c0_16 = arith.constant 0 : index
    %19 = vector.load %arg6[%c0_15, %c0_16] : memref<1x128xf32, #tpu.memory_space<vmem>>, vector<1x128xf32>
    %20 = vector.broadcast %19 : vector<1x128xf32> to vector<128x128xf32>
    %21 = arith.addf %18, %20 : vector<128x128xf32>
    %22 = arith.truncf %21 : vector<128x128xf32> to vector<128x128xbf16>
    %c0_17 = arith.constant 0 : index
    %c0_18 = arith.constant 0 : index
    %23 = vector.load %arg7[%c0_17, %c0_18] : memref<128x128xbf16, #tpu.memory_space<vmem>>, vector<128x128xbf16>
    tpu.vector_store %arg7[%c0_17, %c0_18], %22 {strides = array<i32>} : memref<128x128xbf16, #tpu.memory_space<vmem>>, vector<128x128xbf16>,
    return
  }
}

</mosaic_0001>

<bundles_post_ra>
// kernel: mlp_forward.1
= control target key start
LH: loop header
LB: loop body
LE: loop exit
PB: predicated region body
PF: predicated region fallthrough
CT: control target
= control target key end

     0   :  { %s1700_s1 = inlined_call_operand.vmem [shape: bf16[256,256], index: 1, kind: input, shape index: {}]   ;;  %s1701_s0 = inlined_call_operand.vmem [shape: bf16[128,256], index: 0, kind: input, shape index: {}]   ;;  %s1702_s3 = inlined_call_operand.vmem [shape: bf16[256,128], index: 3, kind: input, shape index: {}]   ;;  %s1703_s5 = inlined_call_operand.vmem [shape: bf16[128,128], index: 5, kind: input, shape index: {}]   ;;  %s1704_s2 = inlined_call_operand.vmem [shape: f32[1,256], index: 2, kind: input, shape index: {}]   ;;  %s1705_s4 = inlined_call_operand.vmem [shape: f32[1,128], index: 4, kind: input, shape index: {}]   ;;  %s1706_s6 = inlined_call_operand.vmem [shape: f32[1,128], index: 6, kind: input, shape index: {}]   ;;  %s1707_s7 = inlined_call_operand.vmem [shape: bf16[128,128], index: 7, kind: output, shape index: {}]  }
   0x1   :  { %v1261_v0 = vld [vmem:[%s1700_s1 + $0x74] ss:$8 sps:$4 sm:$0xff]   ;;  %v1263_v1 = vld [vmem:[%s1700_s1 + $0x70] ss:$8 sps:$4 sm:$0xff]   ;;  %v1264_v2 = vld [vmem:[%s1700_s1 + $0x64] ss:$8 sps:$4 sm:$0xff]  }
   0x2   :  { %327 = vmatprep.subr.bf16.mxu0 %v1261_v0  ;;  %v1266_v3 = vld [vmem:[%s1700_s1 + $0x60] ss:$8 sps:$4 sm:$0xff]   ;;  %v1267_v4 = vld [vmem:[%s1700_s1 + $0x54] ss:$8 sps:$4 sm:$0xff]   ;;  %v1269_v5 = vld [vmem:[%s1700_s1 + $0x50] ss:$8 sps:$4 sm:$0xff]  }
   0x3   :  { %328 = vmatpush1.bf16.msra.mxu0 %v1263_v1  ;;  %v1270_v6 = vld [vmem:[%s1700_s1 + $0x44] ss:$8 sps:$4 sm:$0xff]   ;;  %v1272_v7 = vld [vmem:[%s1700_s1 + $0x40] ss:$8 sps:$4 sm:$0xff]   ;;  %v1273_v8 = vld [vmem:[%s1700_s1 + $0x34] ss:$8 sps:$4 sm:$0xff]   ;;  %v77_v1 = vlaneseq }
   0x4   :  { %329 = vmatprep.subr.bf16.mxu0 %v1264_v2  ;;  %v1275_v9 = vld [vmem:[%s1700_s1 + $0x30] ss:$8 sps:$4 sm:$0xff]   ;;  %v1276_v10 = vld [vmem:[%s1700_s1 + $0x24] ss:$8 sps:$4 sm:$0xff]   ;;  %v1278_v11 = vld [vmem:[%s1700_s1 + $0x20] ss:$8 sps:$4 sm:$0xff]  }
   0x5   :  { %v1279_v12 = vld [vmem:[%s1700_s1 + $0x14] ss:$8 sps:$4 sm:$0xff]   ;;  %v1311_v13 = vld [vmem:[%s1701_s0 + $0x4] ss:$8 sps:$4 sm:$0xff]   ;;  %v1281_v14 = vld [vmem:[%s1700_s1 + $0x10] ss:$8 sps:$4 sm:$0xff]  }
   0x6   :  { %v1282_v15 = vld [vmem:[%s1700_s1 + $0x4] ss:$8 sps:$4 sm:$0xff]   ;;  %359 = vmatprep.mubr.bf16.mxu0 %v1311_v13  ;;  %v1284_v16 = vld [vmem:[%s1700_s1] ss:$8 sps:$4 sm:$0xff]   ;;  %v1285_v17 = vld [vmem:[%s1700_s1 + $0xf4] ss:$8 sps:$4 sm:$0xff]  }
   0x7   :  { %330 = vmatpush1.bf16.msra.mxu0 %v1266_v3  ;;  %v1287_v18 = vld [vmem:[%s1700_s1 + $0xf0] ss:$8 sps:$4 sm:$0xff]   ;;  %v1288_v19 = vld [vmem:[%s1700_s1 + $0xe4] ss:$8 sps:$4 sm:$0xff]   ;;  %v1290_v21 = vld [vmem:[%s1700_s1 + $0xe0] ss:$8 sps:$4 sm:$0xff]  }
   0x8   :  { %331 = vmatprep.subr.bf16.mxu0 %v1267_v4  ;;  %v1333_v20 = vld [vmem:[%s1702_s3 + $0x78] sm:$0xff]   ;;  %v1335_v24 = vld [vmem:[%s1702_s3 + $0x70] sm:$0xff]   ;;  %v1337_v26 = vld [vmem:[%s1702_s3 + $0x68] sm:$0xff]   ;;  %v78_v2 = vshrl.u32 %v77_v1, 7 }
   0x9   :  { %v1334_v22 = vld [vmem:[%s1702_s3 + $0x38] sm:$0xff]   ;;  %1149 = vmatprep.subr.bf16.mxu1 %v1333_v20  ;;  %v1336_v25 = vld [vmem:[%s1702_s3 + $0x30] sm:$0xff]   ;;  %v1294_v28 = vld [vmem:[%s1700_s1 + $0xc4] ss:$8 sps:$4 sm:$0xff]  }
   0xa   :  { %v1291_v23 = vld [vmem:[%s1700_s1 + $0xd4] ss:$8 sps:$4 sm:$0xff]   ;;  %1150 = vmatpush3.bf16.msra.mxu1 %v1334_v22  ;;  %v1293_v27 = vld [vmem:[%s1700_s1 + $0xd0] ss:$8 sps:$4 sm:$0xff]   ;;  %v1338_v29 = vld [vmem:[%s1702_s3 + $0x28] sm:$0xff]   ;;  %v83_v3 = vsub.s32 1, %v78_v2 }
   0xb   :  { %332 = vmatpush1.bf16.msra.mxu0 %v1269_v5  ;;  %1151 = vmatprep.subr.bf16.mxu1 %v1335_v24  ;;  %v1339_v30 = vld [vmem:[%s1702_s3 + $0x60] sm:$0xff]   ;;  %v1297_v33 = vld [vmem:[%s1700_s1 + $0xb4] ss:$8 sps:$4 sm:$0xff]   ;;  %v1299_v35 = vld [vmem:[%s1700_s1 + $0xb0] ss:$8 sps:$4 sm:$0xff]   ;;  %v79_v4 = vsub.s32 0, %v78_v2 }
   0xc   :  { %333 = vmatprep.subr.bf16.mxu0 %v1270_v6  ;;  %v1296_v31 = vld [vmem:[%s1700_s1 + $0xc0] ss:$8 sps:$4 sm:$0xff]   ;;  %v1341_v34 = vld [vmem:[%s1702_s3 + $0x58] sm:$0xff]   ;;  %v1300_v37 = vld [vmem:[%s1700_s1 + $0xa4] ss:$8 sps:$4 sm:$0xff]  }
   0xd   :  { %v1340_v32 = vld [vmem:[%s1702_s3 + $0x20] sm:$0xff]   ;;  %v1342_v36 = vld [vmem:[%s1702_s3 + $0x18] sm:$0xff]   ;;  %v1343_v58 = vld [vmem:[%s1702_s3 + $0x50] sm:$0xff]  }
   0xe   :  { %1152 = vmatpush3.bf16.msra.mxu1 %v1336_v25  ;;  %v1302_v38 = vld [vmem:[%s1700_s1 + $0xa0] ss:$8 sps:$4 sm:$0xff]   ;;  %v1303_v39 = vld [vmem:[%s1700_s1 + $0x94] ss:$8 sps:$4 sm:$0xff]   ;;  %v1305_v40 = vld [vmem:[%s1700_s1 + $0x90] ss:$8 sps:$4 sm:$0xff]  }
   0xf   :  { %334 = vmatpush1.bf16.msra.mxu0 %v1272_v7  ;;  %1153 = vmatprep.subr.bf16.mxu1 %v1337_v26  ;;  %v1306_v41 = vld [vmem:[%s1700_s1 + $0x84] ss:$8 sps:$4 sm:$0xff]   ;;  %v1308_v42 = vld [vmem:[%s1700_s1 + $0x80] ss:$8 sps:$4 sm:$0xff]   ;;  %v1312_v44 = vld [vmem:[%s1701_s0 + $0x14] ss:$8 sps:$4 sm:$0xff]  }
  0x10   :  { %335 = vmatprep.subr.bf16.mxu0 %v1273_v8  ;;  %v1309_v43 = vld [vmem:[%s1701_s0] ss:$8 sps:$4 sm:$0xff]   ;;  %v1314_v45 = vld [vmem:[%s1701_s0 + $0x10] ss:$8 sps:$4 sm:$0xff]   ;;  %v1315_v46 = vld [vmem:[%s1701_s0 + $0x24] ss:$8 sps:$4 sm:$0xff]  }
  0x11   :  { %v1317_v47 = vld [vmem:[%s1701_s0 + $0x20] ss:$8 sps:$4 sm:$0xff]   ;;  %v1318_v48 = vld [vmem:[%s1701_s0 + $0x34] ss:$8 sps:$4 sm:$0xff]   ;;  %v1320_v49 = vld [vmem:[%s1701_s0 + $0x30] ss:$8 sps:$4 sm:$0xff]  }
  0x12   :  { %1154 = vmatpush3.bf16.msra.mxu1 %v1338_v29  ;;  %v1321_v50 = vld [vmem:[%s1701_s0 + $0x44] ss:$8 sps:$4 sm:$0xff]   ;;  %v1323_v51 = vld [vmem:[%s1701_s0 + $0x40] ss:$8 sps:$4 sm:$0xff]   ;;  %v1324_v52 = vld [vmem:[%s1701_s0 + $0x54] ss:$8 sps:$4 sm:$0xff]  }
  0x13   :  { %336 = vmatpush1.bf16.msra.mxu0 %v1275_v9  ;;  %1155 = vmatprep.subr.bf16.mxu1 %v1339_v30  ;;  %v1326_v53 = vld [vmem:[%s1701_s0 + $0x50] ss:$8 sps:$4 sm:$0xff]   ;;  %v1327_v54 = vld [vmem:[%s1701_s0 + $0x64] ss:$8 sps:$4 sm:$0xff]   ;;  %v1329_v55 = vld [vmem:[%s1701_s0 + $0x60] ss:$8 sps:$4 sm:$0xff]  }
  0x14   :  { %337 = vmatprep.subr.bf16.mxu0 %v1276_v10  ;;  %v1330_v56 = vld [vmem:[%s1701_s0 + $0x74] ss:$8 sps:$4 sm:$0xff]   ;;  %v1332_v57 = vld [vmem:[%s1701_s0 + $0x70] ss:$8 sps:$4 sm:$0xff]   ;;  %v1345_v60 = vld [vmem:[%s1702_s3 + $0x48] sm:$0xff]  }
  0x15   :  { %v1344_v59 = vld [vmem:[%s1702_s3 + $0x10] sm:$0xff]   ;;  %v1346_v61 = vld [vmem:[%s1702_s3 + $0x8] sm:$0xff]   ;;  %v1347_v62 = vld [vmem:[%s1702_s3 + $0x40] sm:$0xff]  }
  0x16   :  { %1156 = vmatpush3.bf16.msra.mxu1 %v1340_v32  ;;  %v1348_v63 = vld [vmem:[%s1702_s3] sm:$0xff]   ;;  %v1349_v0 = vld [vmem:[%s1703_s5 + $0x38] sm:$0xff]   ;;  %v1350_v25 = vld [vmem:[%s1703_s5 + $0x30] sm:$0xff]  }
  0x17   :  { %338 = vmatpush1.bf16.msra.mxu0 %v1278_v11  ;;  %1157 = vmatprep.subr.bf16.mxu1 %v1341_v34  ;;  %v75_v5 = vld [vmem:[%s1704_s2] sm:$0x3] }
  0x18   :  { %339 = vmatprep.subr.bf16.mxu0 %v1279_v12  ;;  %v1595_v7 = vrot.slane %v75_v5, %v83_v3  ;;  %v1597_v8 = vrot.slane %v75_v5, %v79_v4 }
  0x1a   :  { %1158 = vmatpush3.bf16.msra.mxu1 %v1342_v36 }
  0x1b   :  { %340 = vmatpush1.bf16.msra.mxu0 %v1281_v14  ;;  %1159 = vmatprep.subr.bf16.mxu1 %v1343_v58 }
  0x1c   :  { %341 = vmatprep.subr.bf16.mxu0 %v1282_v15 }
  0x1e   :  { %1160 = vmatpush3.bf16.msra.mxu1 %v1344_v59 }
  0x1f   :  { %342 = vmatpush1.bf16.msra.mxu0 %v1284_v16  ;;  %1161 = vmatprep.subr.bf16.mxu1 %v1345_v60 }
  0x20   :  { %343 = vmatprep.subr.bf16.mxu0 %v1285_v17 }
  0x22   :  { %1162 = vmatpush3.bf16.msra.mxu1 %v1346_v61 }
  0x23   :  { %344 = vmatpush2.bf16.msra.mxu0 %v1287_v18  ;;  %1163 = vmatprep.subr.bf16.mxu1 %v1347_v62 }
  0x24   :  { %345 = vmatprep.subr.bf16.mxu0 %v1288_v19 }
  0x26   :  { %1164 = vmatpush3.bf16.msra.mxu1 %v1348_v63 }
  0x27   :  { %346 = vmatpush2.bf16.msra.mxu0 %v1290_v21  ;;  %1229 = vmatprep.subr.bf16.mxu1 %v1349_v0 }
  0x28   :  { %347 = vmatprep.subr.bf16.mxu0 %v1291_v23 }
  0x2b   :  { %348 = vmatpush2.bf16.msra.mxu0 %v1293_v27 }
  0x2c   :  { %349 = vmatprep.subr.bf16.mxu0 %v1294_v28 }
  0x2f   :  { %350 = vmatpush2.bf16.msra.mxu0 %v1296_v31 }
  0x30   :  { %351 = vmatprep.subr.bf16.mxu0 %v1297_v33  ;;  %v1351_v33 = vld [vmem:[%s1703_s5 + $0x28] sm:$0xff]  }
  0x33   :  { %352 = vmatpush2.bf16.msra.mxu0 %v1299_v35 }
  0x34   :  { %353 = vmatprep.subr.bf16.mxu0 %v1300_v37 }
  0x37   :  { %354 = vmatpush2.bf16.msra.mxu0 %v1302_v38 }
  0x38   :  { %355 = vmatprep.subr.bf16.mxu0 %v1303_v39 }
  0x3b   :  { %356 = vmatpush2.bf16.msra.mxu0 %v1305_v40 }
  0x3c   :  { %357 = vmatprep.subr.bf16.mxu0 %v1306_v41 }
  0x3f   :  { %358 = vmatpush2.bf16.msra.mxu0 %v1308_v42 }
  0x42   :  { %360 = vmatmul.mubr.bf16.vlgmr.msra.gmra.mxu0 %v1309_v43 }
  0x43   :  { %369 = vmatprep.mubr.bf16.mxu0 %v1312_v44 }
  0x4a   :  { %370 = vmatmul.mubr.bf16.gmra.mxu0 %v1314_v45 }
  0x4b   :  { %379 = vmatprep.mubr.bf16.mxu0 %v1315_v46 }
  0x52   :  { %380 = vmatmul.mubr.bf16.gmra.mxu0 %v1317_v47 }
  0x53   :  { %389 = vmatprep.mubr.bf16.mxu0 %v1318_v48 }
  0x5a   :  { %390 = vmatmul.mubr.bf16.gmra.mxu0 %v1320_v49 }
  0x5b   :  { %399 = vmatprep.mubr.bf16.mxu0 %v1321_v50 }
  0x62   :  { %400 = vmatmul.mubr.bf16.gmra.mxu0 %v1323_v51 }
  0x63   :  { %409 = vmatprep.mubr.bf16.mxu0 %v1324_v52 }
  0x6a   :  { %410 = vmatmul.mubr.bf16.gmra.mxu0 %v1326_v53 }
  0x6b   :  { %419 = vmatprep.mubr.bf16.mxu0 %v1327_v54 }
  0x72   :  { %420 = vmatmul.mubr.bf16.gmra.mxu0 %v1329_v55 }
  0x73   :  { %429 = vmatprep.mubr.bf16.mxu0 %v1330_v56 }
  0x7a   :  { %430 = vmatmul.mubr.bf16.gmra.mxu0 %v1332_v57 }
 0x102   :  { %v361_v6 = vpop.f32.mrf.mxu0 }
 0x103   :  { %v362_v13 = vadd.f32 %v361_v6, %v1597_v8 }
 0x104   :  { %v363_v9 = vpop.f32.mrf.mxu0 }
 0x105   :  { %v364_v11 = vadd.f32 %v363_v9, %v1595_v7  ;;  %v440_v20 = vmax.f32 %v362_v13, 0.0 }
 0x106   :  { %v365_v10 = vpop.f32.mrf.mxu0 }
 0x107   :  { %v366_v12 = vadd.f32 %v365_v10, %v1597_v8  ;;  %v441_v18 = vmax.f32 %v364_v11, 0.0 }
 0x108   :  { %v367_v14 = vpop.f32.mrf.mxu0 }
 0x109   :  { %v368_v15 = vadd.f32 %v367_v14, %v1595_v7  ;;  %v442_v16 = vmax.f32 %v366_v12, 0.0 }
 0x10a   :  { %v371_v17 = vpop.f32.mrf.mxu0 }
 0x10b   :  { %v443_v19 = vmax.f32 %v368_v15, 0.0  ;;  %v472_v23 = vpack.c.bf16 %v442_v16, %v440_v20  ;;  %v372_v28 = vadd.f32 %v371_v17, %v1597_v8 }
 0x10c   :  { %v373_v21 = vpop.f32.mrf.mxu0 }
 0x10d   :  { %v473_v22 = vpack.c.bf16 %v443_v19, %v441_v18  ;;  %v374_v26 = vadd.f32 %v373_v21, %v1595_v7  ;;  %v444_v36 = vmax.f32 %v372_v28, 0.0 }
 0x10e   :  { %v375_v24 = vpop.f32.mrf.mxu0 }
 0x10f   :  { %v376_v27 = vadd.f32 %v375_v24, %v1597_v8  ;;  %655 = vmatprep.mubr.bf16.mxu1 %v473_v22  ;;  %v445_v34 = vmax.f32 %v374_v26, 0.0 }
 0x110   :  { %v377_v29 = vpop.f32.mrf.mxu0  ;;  %656 = vmatmul.mubr.bf16.vlgmr.msra.gmra.mxu1 %v472_v23 }
 0x111   :  { %v378_v30 = vadd.f32 %v377_v29, %v1595_v7  ;;  %1230 = vmatpush3.bf16.msra.mxu1 %v1349_v0  ;;  %v446_v31 = vmax.f32 %v376_v27, 0.0 }
 0x112   :  { %v381_v32 = vpop.f32.mrf.mxu0  ;;  %1231 = vmatprep.subr.bf16.mxu1 %v1350_v25 }
 0x113   :  { %v447_v35 = vmax.f32 %v378_v30, 0.0  ;;  %v474_v39 = vpack.c.bf16 %v446_v31, %v444_v36  ;;  %v382_v43 = vadd.f32 %v381_v32, %v1597_v8 }
 0x114   :  { %v383_v37 = vpop.f32.mrf.mxu0 }
 0x115   :  { %v475_v38 = vpack.c.bf16 %v447_v35, %v445_v34  ;;  %1232 = vmatpush3.bf16.msra.mxu1 %v1350_v25  ;;  %v384_v41 = vadd.f32 %v383_v37, %v1595_v7  ;;  %v448_v50 = vmax.f32 %v382_v43, 0.0 }
 0x116   :  { %v385_v40 = vpop.f32.mrf.mxu0  ;;  %1233 = vmatprep.subr.bf16.mxu1 %v1351_v33 }
 0x117   :  { %v386_v42 = vadd.f32 %v385_v40, %v1597_v8  ;;  %663 = vmatprep.mubr.bf16.mxu1 %v475_v38  ;;  %v449_v48 = vmax.f32 %v384_v41, 0.0 }
 0x118   :  { %v387_v44 = vpop.f32.mrf.mxu0  ;;  %664 = vmatmul.mubr.bf16.gmra.mxu1 %v474_v39 }
 0x119   :  { %v388_v45 = vadd.f32 %v387_v44, %v1595_v7  ;;  %1234 = vmatpush3.bf16.msra.mxu1 %v1351_v33  ;;  %v450_v46 = vmax.f32 %v386_v42, 0.0 }
 0x11a   :  { %v391_v47 = vpop.f32.mrf.mxu0 }
 0x11b   :  { %v451_v49 = vmax.f32 %v388_v45, 0.0  ;;  %v476_v53 = vpack.c.bf16 %v450_v46, %v448_v50  ;;  %v392_v57 = vadd.f32 %v391_v47, %v1597_v8 }
 0x11c   :  { %v393_v51 = vpop.f32.mrf.mxu0 }
 0x11d   :  { %v477_v52 = vpack.c.bf16 %v451_v49, %v449_v48  ;;  %v394_v55 = vadd.f32 %v393_v51, %v1595_v7  ;;  %v452_v0 = vmax.f32 %v392_v57, 0.0 }
 0x11e   :  { %v395_v54 = vpop.f32.mrf.mxu0 }
 0x11f   :  { %v396_v56 = vadd.f32 %v395_v54, %v1597_v8  ;;  %671 = vmatprep.mubr.bf16.mxu1 %v477_v52  ;;  %v453_v62 = vmax.f32 %v394_v55, 0.0 }
 0x120   :  { %v397_v58 = vpop.f32.mrf.mxu0  ;;  %672 = vmatmul.mubr.bf16.gmra.mxu1 %v476_v53 }
 0x121   :  { %v398_v59 = vadd.f32 %v397_v58, %v1595_v7  ;;  %v454_v60 = vmax.f32 %v396_v56, 0.0 }
 0x122   :  { %v401_v61 = vpop.f32.mrf.mxu0 }
 0x123   :  { %v455_v63 = vmax.f32 %v398_v59, 0.0  ;;  %v478_v3 = vpack.c.bf16 %v454_v60, %v452_v0  ;;  %v402_v9 = vadd.f32 %v401_v61, %v1597_v8  ;;  %v1352_v60 = vld [vmem:[%s1703_s5 + $0x20] sm:$0xff]   ;;  %v1355_v61 = vld [vmem:[%s1703_s5 + $0x8] sm:$0xff]  }
 0x124   :  { %v403_v1 = vpop.f32.mrf.mxu0  ;;  %1235 = vmatprep.subr.bf16.mxu1 %v1352_v60 }
 0x125   :  { %v479_v2 = vpack.c.bf16 %v455_v63, %v453_v62  ;;  %v404_v5 = vadd.f32 %v403_v1, %v1595_v7  ;;  %v456_v16 = vmax.f32 %v402_v9, 0.0  ;;  %1236 = vmatpush3.bf16.msra.mxu1 %v1352_v60  ;;  %v1356_v62 = vld [vmem:[%s1703_s5] sm:$0xff]  }
 0x126   :  { %v405_v4 = vpop.f32.mrf.mxu0 }
 0x127   :  { %v406_v6 = vadd.f32 %v405_v4, %v1597_v8  ;;  %679 = vmatprep.mubr.bf16.mxu1 %v479_v2  ;;  %v457_v14 = vmax.f32 %v404_v5, 0.0  ;;  %v1655_v2 = vld [vmem:[%s1705_s4] ss:$0 sm:$0xff] }
 0x128   :  { %v407_v10 = vpop.f32.mrf.mxu0  ;;  %680 = vmatmul.mubr.bf16.gmra.mxu1 %v478_v3 }
 0x129   :  { %v408_v11 = vadd.f32 %v407_v10, %v1595_v7  ;;  %v458_v12 = vmax.f32 %v406_v6, 0.0 }
 0x12a   :  { %v411_v13 = vpop.f32.mrf.mxu0 }
 0x12b   :  { %v459_v15 = vmax.f32 %v408_v11, 0.0  ;;  %v480_v19 = vpack.c.bf16 %v458_v12, %v456_v16  ;;  %v412_v23 = vadd.f32 %v411_v13, %v1597_v8 }
 0x12c   :  { %v413_v17 = vpop.f32.mrf.mxu0 }
 0x12d   :  { %v481_v18 = vpack.c.bf16 %v459_v15, %v457_v14  ;;  %v414_v21 = vadd.f32 %v413_v17, %v1595_v7  ;;  %v460_v30 = vmax.f32 %v412_v23, 0.0 }
 0x12e   :  { %v415_v20 = vpop.f32.mrf.mxu0 }
 0x12f   :  { %v416_v22 = vadd.f32 %v415_v20, %v1597_v8  ;;  %687 = vmatprep.mubr.bf16.mxu1 %v481_v18  ;;  %v461_v28 = vmax.f32 %v414_v21, 0.0 }
 0x130   :  { %v417_v24 = vpop.f32.mrf.mxu0  ;;  %688 = vmatmul.mubr.bf16.gmra.mxu1 %v480_v19 }
 0x131   :  { %v418_v25 = vadd.f32 %v417_v24, %v1595_v7  ;;  %v462_v26 = vmax.f32 %v416_v22, 0.0 }
 0x132   :  { %v421_v27 = vpop.f32.mrf.mxu0 }
 0x133   :  { %v463_v29 = vmax.f32 %v418_v25, 0.0  ;;  %v482_v33 = vpack.c.bf16 %v462_v26, %v460_v30  ;;  %v422_v37 = vadd.f32 %v421_v27, %v1597_v8 }
 0x134   :  { %v423_v31 = vpop.f32.mrf.mxu0 }
 0x135   :  { %v483_v32 = vpack.c.bf16 %v463_v29, %v461_v28  ;;  %v424_v35 = vadd.f32 %v423_v31, %v1595_v7  ;;  %v464_v44 = vmax.f32 %v422_v37, 0.0 }
 0x136   :  { %v425_v34 = vpop.f32.mrf.mxu0 }
 0x137   :  { %v426_v36 = vadd.f32 %v425_v34, %v1597_v8  ;;  %695 = vmatprep.mubr.bf16.mxu1 %v483_v32  ;;  %v465_v42 = vmax.f32 %v424_v35, 0.0 }
 0x138   :  { %v427_v38 = vpop.f32.mrf.mxu0  ;;  %696 = vmatmul.mubr.bf16.gmra.mxu1 %v482_v33 }
 0x139   :  { %v428_v39 = vadd.f32 %v427_v38, %v1595_v7  ;;  %v466_v40 = vmax.f32 %v426_v36, 0.0 }
 0x13a   :  { %v431_v41 = vpop.f32.mrf.mxu0 }
 0x13b   :  { %v467_v43 = vmax.f32 %v428_v39, 0.0  ;;  %v484_v47 = vpack.c.bf16 %v466_v40, %v464_v44  ;;  %v432_v51 = vadd.f32 %v431_v41, %v1597_v8 }
 0x13c   :  { %v433_v45 = vpop.f32.mrf.mxu0 }
 0x13d   :  { %v485_v46 = vpack.c.bf16 %v467_v43, %v465_v42  ;;  %v434_v49 = vadd.f32 %v433_v45, %v1595_v7  ;;  %v468_v57 = vmax.f32 %v432_v51, 0.0 }
 0x13e   :  { %v435_v48 = vpop.f32.mrf.mxu0 }
 0x13f   :  { %v436_v50 = vadd.f32 %v435_v48, %v1597_v8  ;;  %703 = vmatprep.mubr.bf16.mxu1 %v485_v46  ;;  %v469_v55 = vmax.f32 %v434_v49, 0.0  ;;  %v1353_v8 = vld [vmem:[%s1703_s5 + $0x18] sm:$0xff]  }
 0x140   :  { %v437_v52 = vpop.f32.mrf.mxu0  ;;  %704 = vmatmul.mubr.bf16.gmra.mxu1 %v484_v47  ;;  %1237 = vmatprep.subr.bf16.mxu1 %v1353_v8 }
 0x141   :  { %v438_v53 = vadd.f32 %v437_v52, %v1595_v7  ;;  %v470_v54 = vmax.f32 %v436_v50, 0.0  ;;  %1238 = vmatpush3.bf16.msra.mxu1 %v1353_v8  ;;  %v1354_v7 = vld [vmem:[%s1703_s5 + $0x10] sm:$0xff]  }
 0x142   :  { %1239 = vmatprep.subr.bf16.mxu1 %v1354_v7 }
 0x143   :  { %v471_v56 = vmax.f32 %v438_v53, 0.0  ;;  %v486_v59 = vpack.c.bf16 %v470_v54, %v468_v57 }
 0x145   :  { %v487_v58 = vpack.c.bf16 %v471_v56, %v469_v55  ;;  %1240 = vmatpush3.bf16.msra.mxu1 %v1354_v7 }
 0x146   :  { %1241 = vmatprep.subr.bf16.mxu1 %v1355_v61 }
 0x147   :  { %711 = vmatprep.mubr.bf16.mxu1 %v487_v58 }
 0x148   :  { %712 = vmatmul.mubr.bf16.gmra.mxu1 %v486_v59 }
 0x149   :  { %1242 = vmatpush3.bf16.msra.mxu1 %v1355_v61 }
 0x14a   :  { %1243 = vmatprep.subr.bf16.mxu1 %v1356_v62 }
 0x14d   :  { %1244 = vmatpush3.bf16.msra.mxu1 %v1356_v62 }
 0x1d0   :  { %v1165_v63 = vpop.f32.mrf.mxu1 }
 0x1d2   :  { %v1166_v0 = vpop.f32.mrf.mxu1 }
 0x1d3   :  { %v1167_v1 = vadd.f32 %v1166_v0, %v1165_v63 }
 0x1d4   :  { %v1168_v3 = vpop.f32.mrf.mxu1 }
 0x1d5   :  { %v658_v5 = vadd.f32 %v1167_v1, %v1655_v2 }
 0x1d6   :  { %v1169_v4 = vpop.f32.mrf.mxu1 }
 0x1d7   :  { %v1170_v6 = vadd.f32 %v1169_v4, %v1168_v3  ;;  %v720_v12 = vmax.f32 %v658_v5, 0.0 }
 0x1d8   :  { %v1171_v9 = vpop.f32.mrf.mxu1 }
 0x1d9   :  { %v661_v10 = vadd.f32 %v1170_v6, %v1655_v2 }
 0x1da   :  { %v1172_v11 = vpop.f32.mrf.mxu1 }
 0x1db   :  { %v721_v13 = vmax.f32 %v661_v10, 0.0  ;;  %v1173_v14 = vadd.f32 %v1172_v11, %v1171_v9 }
 0x1dc   :  { %v1174_v15 = vpop.f32.mrf.mxu1 }
 0x1dd   :  { %v736_v16 = vpack.c.bf16 %v721_v13, %v720_v12  ;;  %v666_v18 = vadd.f32 %v1173_v14, %v1655_v2 }
 0x1de   :  { %v1175_v17 = vpop.f32.mrf.mxu1 }
 0x1df   :  { %v1176_v19 = vadd.f32 %v1175_v17, %v1174_v15  ;;  %1245 = vmatprep.mubr.bf16.mxu1 %v736_v16  ;;  %v722_v23 = vmax.f32 %v666_v18, 0.0 }
 0x1e0   :  { %v1177_v20 = vpop.f32.mrf.mxu1 }
 0x1e1   :  { %v669_v21 = vadd.f32 %v1176_v19, %v1655_v2 }
 0x1e2   :  { %v1178_v22 = vpop.f32.mrf.mxu1 }
 0x1e3   :  { %v723_v24 = vmax.f32 %v669_v21, 0.0  ;;  %v1179_v25 = vadd.f32 %v1178_v22, %v1177_v20 }
 0x1e4   :  { %v1180_v26 = vpop.f32.mrf.mxu1 }
 0x1e5   :  { %v737_v27 = vpack.c.bf16 %v723_v24, %v722_v23  ;;  %v674_v29 = vadd.f32 %v1179_v25, %v1655_v2 }
 0x1e6   :  { %v1181_v28 = vpop.f32.mrf.mxu1 }
 0x1e7   :  { %v1182_v30 = vadd.f32 %v1181_v28, %v1180_v26  ;;  %1246 = vmatmul.mubr.bf16.vlgmr.msra.gmra.mxu1 %v737_v27  ;;  %v724_v34 = vmax.f32 %v674_v29, 0.0  ;;  %v1061_v28 = vld [vmem:[%s1706_s6] ss:$0 sm:$0xff] }
 0x1e8   :  { %v1183_v31 = vpop.f32.mrf.mxu1 }
 0x1e9   :  { %v677_v32 = vadd.f32 %v1182_v30, %v1655_v2 }
 0x1ea   :  { %v1184_v33 = vpop.f32.mrf.mxu1 }
 0x1eb   :  { %v725_v35 = vmax.f32 %v677_v32, 0.0  ;;  %v1185_v36 = vadd.f32 %v1184_v33, %v1183_v31 }
 0x1ec   :  { %v1186_v37 = vpop.f32.mrf.mxu1 }
 0x1ed   :  { %v738_v38 = vpack.c.bf16 %v725_v35, %v724_v34  ;;  %v682_v40 = vadd.f32 %v1185_v36, %v1655_v2 }
 0x1ee   :  { %v1187_v39 = vpop.f32.mrf.mxu1 }
 0x1ef   :  { %v1188_v41 = vadd.f32 %v1187_v39, %v1186_v37  ;;  %1249 = vmatprep.mubr.bf16.mxu1 %v738_v38  ;;  %v726_v45 = vmax.f32 %v682_v40, 0.0 }
 0x1f0   :  { %v1189_v42 = vpop.f32.mrf.mxu1 }
 0x1f1   :  { %v685_v43 = vadd.f32 %v1188_v41, %v1655_v2 }
 0x1f2   :  { %v1190_v44 = vpop.f32.mrf.mxu1 }
 0x1f3   :  { %v727_v46 = vmax.f32 %v685_v43, 0.0  ;;  %v1191_v47 = vadd.f32 %v1190_v44, %v1189_v42 }
 0x1f4   :  { %v1192_v48 = vpop.f32.mrf.mxu1 }
 0x1f5   :  { %v739_v49 = vpack.c.bf16 %v727_v46, %v726_v45  ;;  %v690_v51 = vadd.f32 %v1191_v47, %v1655_v2 }
 0x1f6   :  { %v1193_v50 = vpop.f32.mrf.mxu1 }
 0x1f7   :  { %v1194_v52 = vadd.f32 %v1193_v50, %v1192_v48  ;;  %1250 = vmatmul.mubr.bf16.gmra.mxu1 %v739_v49  ;;  %v728_v56 = vmax.f32 %v690_v51, 0.0 }
 0x1f8   :  { %v1195_v53 = vpop.f32.mrf.mxu1 }
 0x1f9   :  { %v693_v54 = vadd.f32 %v1194_v52, %v1655_v2 }
 0x1fa   :  { %v1196_v55 = vpop.f32.mrf.mxu1 }
 0x1fb   :  { %v729_v57 = vmax.f32 %v693_v54, 0.0  ;;  %v1197_v58 = vadd.f32 %v1196_v55, %v1195_v53 }
 0x1fc   :  { %v1198_v59 = vpop.f32.mrf.mxu1 }
 0x1fd   :  { %v740_v60 = vpack.c.bf16 %v729_v57, %v728_v56  ;;  %v698_v7 = vadd.f32 %v1197_v58, %v1655_v2 }
 0x1fe   :  { %v1199_v8 = vpop.f32.mrf.mxu1 }
 0x1ff   :  { %v1200_v61 = vadd.f32 %v1199_v8, %v1198_v59  ;;  %1253 = vmatprep.mubr.bf16.mxu1 %v740_v60  ;;  %v730_v1 = vmax.f32 %v698_v7, 0.0 }
 0x200   :  { %v1201_v62 = vpop.f32.mrf.mxu1 }
 0x201   :  { %v701_v63 = vadd.f32 %v1200_v61, %v1655_v2 }
 0x202   :  { %v1202_v0 = vpop.f32.mrf.mxu1 }
 0x203   :  { %v731_v3 = vmax.f32 %v701_v63, 0.0  ;;  %v1203_v4 = vadd.f32 %v1202_v0, %v1201_v62 }
 0x204   :  { %v1204_v5 = vpop.f32.mrf.mxu1 }
 0x205   :  { %v741_v6 = vpack.c.bf16 %v731_v3, %v730_v1  ;;  %v706_v10 = vadd.f32 %v1203_v4, %v1655_v2 }
 0x206   :  { %v1205_v9 = vpop.f32.mrf.mxu1 }
 0x207   :  { %v1206_v11 = vadd.f32 %v1205_v9, %v1204_v5  ;;  %1254 = vmatmul.mubr.bf16.gmra.mxu1 %v741_v6  ;;  %v732_v15 = vmax.f32 %v706_v10, 0.0 }
 0x208   :  { %v1207_v12 = vpop.f32.mrf.mxu1 }
 0x209   :  { %v709_v13 = vadd.f32 %v1206_v11, %v1655_v2 }
 0x20a   :  { %v1208_v14 = vpop.f32.mrf.mxu1 }
 0x20b   :  { %v733_v16 = vmax.f32 %v709_v13, 0.0  ;;  %v1209_v17 = vadd.f32 %v1208_v14, %v1207_v12 }
 0x20c   :  { %v1210_v18 = vpop.f32.mrf.mxu1 }
 0x20d   :  { %v742_v19 = vpack.c.bf16 %v733_v16, %v732_v15  ;;  %v714_v21 = vadd.f32 %v1209_v17, %v1655_v2 }
 0x20e   :  { %v1211_v20 = vpop.f32.mrf.mxu1 }
 0x20f   :  { %v1212_v22 = vadd.f32 %v1211_v20, %v1210_v18  ;;  %1257 = vmatprep.mubr.bf16.mxu1 %v742_v19  ;;  %v734_v24 = vmax.f32 %v714_v21, 0.0 }
 0x211   :  { %v717_v23 = vadd.f32 %v1212_v22, %v1655_v2 }
 0x213   :  { %v735_v25 = vmax.f32 %v717_v23, 0.0 }
 0x215   :  { %v743_v26 = vpack.c.bf16 %v735_v25, %v734_v24 }
 0x217   :  { %1258 = vmatmul.mubr.bf16.gmra.mxu1 %v743_v26 }
 0x2a7   :  { %v1247_v27 = vpop.f32.mrf.mxu1 }
 0x2a8   :  { %v858_v31 = vadd.f32 %v1247_v27, %v1061_v28 }
 0x2a9   :  { %v849_v29 = vpop.f32.mrf.mxu1 }
 0x2aa   :  { %v850_v34 = vadd.f32 %v1061_v28, %v849_v29 }
 0x2ab   :  { %v1248_v30 = vpop.f32.mrf.mxu1 }
 0x2ac   :  { %v861_v32 = vadd.f32 %v1248_v30, %v1061_v28 }
 0x2ad   :  { %v852_v33 = vpop.f32.mrf.mxu1 }
 0x2ae   :  { %v1110_v35 = vpack.c.bf16 %v861_v32, %v858_v31  ;;  %v853_v36 = vadd.f32 %v1061_v28, %v852_v33 }
 0x2b0   :  { %1142 = vst [vmem:[%s1707_s7 + $0x8] sm:$0xff] %v1110_v35   ;;  %v1105_v2 = vpack.c.bf16 %v853_v36, %v850_v34 }
 0x2b2   :  { %1106 = vst [vmem:[%s1707_s7] sm:$0xff] %v1105_v2  }
 0x2b7   :  { %v1251_v37 = vpop.f32.mrf.mxu1 }
 0x2b8   :  { %v874_v40 = vadd.f32 %v1251_v37, %v1061_v28 }
 0x2b9   :  { %v865_v38 = vpop.f32.mrf.mxu1 }
 0x2ba   :  { %v866_v43 = vadd.f32 %v1061_v28, %v865_v38 }
 0x2bb   :  { %v1252_v39 = vpop.f32.mrf.mxu1 }
 0x2bc   :  { %v877_v41 = vadd.f32 %v1252_v39, %v1061_v28 }
 0x2bd   :  { %v868_v42 = vpop.f32.mrf.mxu1 }
 0x2be   :  { %v1120_v44 = vpack.c.bf16 %v877_v41, %v874_v40  ;;  %v869_v45 = vadd.f32 %v1061_v28, %v868_v42 }
 0x2c0   :  { %1144 = vst [vmem:[%s1707_s7 + $0x18] sm:$0xff] %v1120_v44   ;;  %v1115_v46 = vpack.c.bf16 %v869_v45, %v866_v43 }
 0x2c2   :  { %1143 = vst [vmem:[%s1707_s7 + $0x10] sm:$0xff] %v1115_v46  }
 0x2c7   :  { %v1255_v47 = vpop.f32.mrf.mxu1 }
 0x2c8   :  { %v890_v50 = vadd.f32 %v1255_v47, %v1061_v28 }
 0x2c9   :  { %v881_v48 = vpop.f32.mrf.mxu1 }
 0x2ca   :  { %v882_v53 = vadd.f32 %v1061_v28, %v881_v48 }
 0x2cb   :  { %v1256_v49 = vpop.f32.mrf.mxu1 }
 0x2cc   :  { %v893_v51 = vadd.f32 %v1256_v49, %v1061_v28 }
 0x2cd   :  { %v884_v52 = vpop.f32.mrf.mxu1 }
 0x2ce   :  { %v1130_v54 = vpack.c.bf16 %v893_v51, %v890_v50  ;;  %v885_v55 = vadd.f32 %v1061_v28, %v884_v52 }
 0x2d0   :  { %1146 = vst [vmem:[%s1707_s7 + $0x28] sm:$0xff] %v1130_v54   ;;  %v1125_v56 = vpack.c.bf16 %v885_v55, %v882_v53 }
 0x2d2   :  { %1145 = vst [vmem:[%s1707_s7 + $0x20] sm:$0xff] %v1125_v56  }
 0x2d7   :  { %v1259_v57 = vpop.f32.mrf.mxu1 }
 0x2d8   :  { %v906_v60 = vadd.f32 %v1259_v57, %v1061_v28 }
 0x2d9   :  { %v897_v58 = vpop.f32.mrf.mxu1 }
 0x2da   :  { %v898_v61 = vadd.f32 %v1061_v28, %v897_v58 }
 0x2db   :  { %v1260_v59 = vpop.f32.mrf.mxu1 }
 0x2dc   :  { %v909_v8 = vadd.f32 %v1260_v59, %v1061_v28 }
 0x2dd   :  { %v900_v7 = vpop.f32.mrf.mxu1 }
 0x2de   :  { %v1140_v62 = vpack.c.bf16 %v909_v8, %v906_v60  ;;  %v901_v63 = vadd.f32 %v1061_v28, %v900_v7 }
 0x2e0   :  { %1148 = vst [vmem:[%s1707_s7 + $0x38] sm:$0xff] %v1140_v62   ;;  %v1135_v0 = vpack.c.bf16 %v901_v63, %v898_v61 }
 0x2e2   :  { %1147 = vst [vmem:[%s1707_s7 + $0x30] sm:$0xff] %v1135_v0  }

</bundles_post_ra>
